<compile_context>
chip_gen: v7x
topology: tpu7x:2x2x1
jax: 0.10.0
libtpu: 0.0.40
codegen_flags: <defaults>
</compile_context>

<pallas_src>
import numpy as np

import jax
import jax.numpy as jnp
from jax.experimental import pallas as pl
from jax.experimental.pallas import tpu as pltpu


# ----------------------------- Pallas kernel -------------------------------- #

def _preact_block_kernel(x_ref, w1_ref, w2_ref, s1_ref, b1_ref, s2_ref, b2_ref,
                         o_ref, pad1, pad2):
    """Fused bn1+relu -> conv1(3x3) -> bn2+relu -> conv2(3x3) + residual.

    x_ref:  (1, H, W*Cin)        one batch element, row-slab layout
    w1_ref: (3, W*Cin, W*P)      conv1 banded weights, one matrix per kh
    w2_ref: (3, W*P,   W*P)      conv2 banded weights
    s*/b*:  (1, W*C)             folded BatchNorm scale/bias, pre-tiled along W
    o_ref:  (1, H, W*P)
    pad1:   (H+2, W*Cin)         VMEM scratch, H-halo'd activation for conv1
    pad2:   (H+2, W*P)           VMEM scratch for conv2
    """
    _, H, WC = x_ref.shape
    WP = o_ref.shape[2]
    KH = w1_ref.shape[0]

    x = x_ref[0]                                               # (H, W*Cin), f32

    # ---- bn1 + relu (64-lane VPU math, no extra HBM traffic) ----
    a1 = jnp.maximum(x * s1_ref[...] + b1_ref[...], 0.0)       # (H, W*Cin)

    # ---- conv1: H-halo in VMEM scratch + 3 banded matmuls ----
    pad1[0:1, :] = jnp.zeros((1, WC), jnp.float32)             # top halo row
    pad1[H + 1:H + 2, :] = jnp.zeros((1, WC), jnp.float32)     # bottom halo row
    pad1[1:H + 1, :] = a1

    y1 = jnp.dot(pad1[0:H, :], w1_ref[0],
                 preferred_element_type=jnp.float32)           # (H, W*P)
    for kh in range(1, KH):
        y1 = y1 + jnp.dot(pad1[kh:kh + H, :], w1_ref[kh],
                          preferred_element_type=jnp.float32)

    # ---- bn2 + relu ----
    a2 = jnp.maximum(y1 * s2_ref[...] + b2_ref[...], 0.0)      # (H, W*P)

    # ---- conv2: halo + 3 banded matmuls, fused identity-residual add ----
    pad2[0:1, :] = jnp.zeros((1, WP), jnp.float32)
    pad2[H + 1:H + 2, :] = jnp.zeros((1, WP), jnp.float32)
    pad2[1:H + 1, :] = a2

    y2 = jnp.dot(pad2[0:H, :], w2_ref[0],
                 preferred_element_type=jnp.float32)           # (H, W*P)
    for kh in range(1, KH):
        y2 = y2 + jnp.dot(pad2[kh:kh + H, :], w2_ref[kh],
                          preferred_element_type=jnp.float32)

    o_ref[0] = (y2 + x).astype(o_ref.dtype)                    # residual (W*P == W*Cin)


# --------------------------- Weight preprocessing ---------------------------- #

def fold_bn(gamma, beta, mean, var, eps=1e-5):
    scale = gamma / jnp.sqrt(var + eps)
    bias = beta - mean * scale
    return scale, bias


def band_weights(w_hwio, width):
    """HWIO (3,3,Cin,P) -> (3, W*Cin, W*P) block-banded matrices (one per kh).

    T_kh[(w+kw-1)*Cin + cin, w*P + p] = w_hwio[kh, kw, cin, p]  (SAME padding
    along W is realized by simply omitting out-of-range rows from the band).
    Indices are static numpy, so this stays jit-friendly; it is a one-time
    weight preprocessing step.
    """
    KH, KW, Cin, P = w_hwio.shape
    mats = []
    for kh in range(KH):
        t4 = jnp.zeros((width, Cin, width, P), w_hwio.dtype)   # (src_w, cin, dst_w, p)
        for kw in range(KW):
            src = np.arange(width) + kw - 1                    # input column per output col
            keep = (src >= 0) & (src < width)
            src_v = src[keep]
            dst_v = np.arange(width)[keep]
            vals = jnp.broadcast_to(w_hwio[kh, kw], (len(src_v), Cin, P))
            t4 = t4.at[src_v, :, dst_v, :].set(vals)
        mats.append(t4.reshape(width * Cin, width * P))
    return jnp.stack(mats)                                     # (3, W*Cin, W*P)


# ------------------------------ Module wrapper ------------------------------ #

def pre_act_basic_block(x_nchw, params, stride=1):
    """Forward pass of PreActBasicBlock (downsample=None).

    x_nchw: (N, C, H, W) float32 — same convention as the PyTorch module.
    """
    assert stride == 1, "TODO(synk): stride>1 / downsample path not implemented"

    x = jnp.transpose(x_nchw, (0, 2, 3, 1))                    # NCHW -> NHWC
    N, H, W, Cin = x.shape
    P = params["w1"].shape[-1]                                 # planes
    assert params["w2"].shape[-1] == Cin, "identity residual needs Cout == Cin"

    s1, b1 = fold_bn(params["bn1_gamma"], params["bn1_beta"],
                     params["bn1_mean"], params["bn1_var"])
    s2, b2 = fold_bn(params["bn2_gamma"], params["bn2_beta"],
                     params["bn2_mean"], params["bn2_var"])

    # One-time banded weight expansion (per-kh Toeplitz along W).
    w1b = band_weights(params["w1"], W)                        # (3, W*Cin, W*P)
    w2b = band_weights(params["w2"], W)                        # (3, W*P,   W*P)

    # Lane-dense row-slab layout for activations and BN params.
    x2d = x.reshape(N, H, W * Cin)
    s1t = jnp.tile(s1, W).reshape(1, W * Cin)
    b1t = jnp.tile(b1, W).reshape(1, W * Cin)
    s2t = jnp.tile(s2, W).reshape(1, W * P)
    b2t = jnp.tile(b2, W).reshape(1, W * P)

    out2d = pl.pallas_call(
        _preact_block_kernel,
        out_shape=jax.ShapeDtypeStruct((N, H, W * P), x.dtype),
        grid_spec=pltpu.PrefetchScalarGridSpec(
            num_scalar_prefetch=0,
            grid=(N,),
            in_specs=[
                pl.BlockSpec((1, H, W * Cin), lambda n: (n, 0, 0)),       # x
                pl.BlockSpec((3, W * Cin, W * P), lambda n: (0, 0, 0)),   # w1 (banded)
                pl.BlockSpec((3, W * P, W * P), lambda n: (0, 0, 0)),     # w2 (banded)
                pl.BlockSpec((1, W * Cin), lambda n: (0, 0)),             # s1 (tiled)
                pl.BlockSpec((1, W * Cin), lambda n: (0, 0)),             # b1
                pl.BlockSpec((1, W * P), lambda n: (0, 0)),               # s2
                pl.BlockSpec((1, W * P), lambda n: (0, 0)),               # b2
            ],
            out_specs=pl.BlockSpec((1, H, W * P), lambda n: (n, 0, 0)),
            scratch_shapes=[
                pltpu.VMEM((H + 2, W * Cin), jnp.float32),                # pad1
                pltpu.VMEM((H + 2, W * P), jnp.float32),                  # pad2
            ],
        ),
        compiler_params=pltpu.CompilerParams(
            dimension_semantics=("parallel",)),
    )(x2d, w1b, w2b, s1t, b1t, s2t, b2t)

    out = out2d.reshape(N, H, W, P)                            # free layout plumbing
    return jnp.transpose(out, (0, 3, 1, 2))                    # NHWC -> NCHW


# ------------------------------- Reference ---------------------------------- #

def _conv_ref(x, w, stride):
    return jax.lax.conv_general_dilated(
        x, w, (stride, stride), ((1, 1), (1, 1)),
        dimension_numbers=("NHWC", "HWIO", "NHWC"))


def pre_act_basic_block_ref(x_nchw, params, stride=1):
    x = jnp.transpose(x_nchw, (0, 2, 3, 1))
    residual = x
    s1, b1 = fold_bn(params["bn1_gamma"], params["bn1_beta"],
                     params["bn1_mean"], params["bn1_var"])
    out = jnp.maximum(x * s1 + b1, 0.0)
    out = _conv_ref(out, params["w1"], stride)
    s2, b2 = fold_bn(params["bn2_gamma"], params["bn2_beta"],
                     params["bn2_mean"], params["bn2_var"])
    out = jnp.maximum(out * s2 + b2, 0.0)
    out = _conv_ref(out, params["w2"], 1)
    out = out + residual
    return jnp.transpose(out, (0, 3, 1, 2))


# --------------------------------- Main -------------------------------------- #

if __name__ == "__main__":
    N, C, H, W = 2, 4, 16, 16          # inplanes = planes = 4, stride = 1
    inplanes = planes = C
    stride = 1

    key = jax.random.PRNGKey(0)
    keys = jax.random.split(key, 9)

    fan_in = inplanes * 3 * 3
    params = {
        # conv weights, HWIO, kaiming-style scaling, deterministic
        "w1": jax.random.normal(keys[0], (3, 3, inplanes, planes), jnp.float32)
              * (2.0 / fan_in) ** 0.5,
        "w2": jax.random.normal(keys[1], (3, 3, planes, planes), jnp.float32)
              * (2.0 / (planes * 9)) ** 0.5,
        # BatchNorm (inference) parameters, deterministic & non-trivial
        "bn1_gamma": 1.0 + 0.1 * jax.random.normal(keys[2], (inplanes,), jnp.float32),
        "bn1_beta": 0.1 * jax.random.normal(keys[3], (inplanes,), jnp.float32),
        "bn1_mean": 0.05 * jax.random.normal(keys[4], (inplanes,), jnp.float32),
        "bn1_var": 1.0 + 0.1 * jax.random.uniform(keys[5], (inplanes,), jnp.float32),
        "bn2_gamma": 1.0 + 0.1 * jax.random.normal(keys[6], (planes,), jnp.float32),
        "bn2_beta": 0.1 * jax.random.normal(keys[7], (planes,), jnp.float32),
        "bn2_mean": jnp.zeros((planes,), jnp.float32),
        "bn2_var": jnp.ones((planes,), jnp.float32),
    }

    x = jax.random.normal(keys[8], (N, C, H, W), jnp.float32)   # NCHW like PyTorch

    out = pre_act_basic_block(x, params, stride=stride)
    out = jax.block_until_ready(out)

    ref = pre_act_basic_block_ref(x, params, stride=stride)
    ref = jax.block_until_ready(ref)

    assert out.shape == (N, planes, H // stride, W // stride), out.shape
    assert jnp.allclose(out, ref, atol=1e-4, rtol=1e-4), \
        float(jnp.max(jnp.abs(out - ref)))

    print("KERNEL_OK")
</pallas_src>

<mosaic_0001>
module attributes {stable_mosaic.version = 11 : i64} {
  func.func @_preact_block_kernel(%arg0: i32, %arg1: memref<1x16x64xf32, #tpu.memory_space<vmem>>, %arg2: memref<3x64x64xf32, #tpu.memory_space<vmem>>, %arg3: memref<3x64x64xf32, #tpu.memory_space<vmem>>, %arg4: memref<1x64xf32, #tpu.memory_space<vmem>>, %arg5: memref<1x64xf32, #tpu.memory_space<vmem>>, %arg6: memref<1x64xf32, #tpu.memory_space<vmem>>, %arg7: memref<1x64xf32, #tpu.memory_space<vmem>>, %arg8: memref<1x16x64xf32, #tpu.memory_space<vmem>>, %arg9: memref<18x64xf32, #tpu.memory_space<vmem>>, %arg10: memref<18x64xf32, #tpu.memory_space<vmem>>) attributes {dimension_semantics = [#tpu.dimension_semantics<parallel>], iteration_bounds = array<i64: 2>, scalar_prefetch = 0 : i64, scratch_operands = 2 : i64, tpu.core_type = #tpu.core_type<tc>, window_params = [{transform_indices = @transform_0, window_bounds = array<i64: 1, 16, 64>}, {pipeline_mode = #tpu.pipeline_mode<synchronous>, transform_indices = @transform_1, window_bounds = array<i64: 3, 64, 64>}, {pipeline_mode = #tpu.pipeline_mode<synchronous>, transform_indices = @transform_2, window_bounds = array<i64: 3, 64, 64>}, {pipeline_mode = #tpu.pipeline_mode<synchronous>, transform_indices = @transform_3, window_bounds = array<i64: 1, 64>}, {pipeline_mode = #tpu.pipeline_mode<synchronous>, transform_indices = @transform_4, window_bounds = array<i64: 1, 64>}, {pipeline_mode = #tpu.pipeline_mode<synchronous>, transform_indices = @transform_5, window_bounds = array<i64: 1, 64>}, {pipeline_mode = #tpu.pipeline_mode<synchronous>, transform_indices = @transform_6, window_bounds = array<i64: 1, 64>}, {transform_indices = @transform_7, window_bounds = array<i64: 1, 16, 64>}]} {
    %c0 = arith.constant 0 : index
    %c0_0 = arith.constant 0 : index
    %c0_1 = arith.constant 0 : index
    %0 = vector.load %arg1[%c0, %c0_0, %c0_1] : memref<1x16x64xf32, #tpu.memory_space<vmem>>, vector<1x16x64xf32>
    %1 = vector.shape_cast %0 : vector<1x16x64xf32> to vector<16x64xf32>
    %c0_2 = arith.constant 0 : index
    %c0_3 = arith.constant 0 : index
    %2 = vector.load %arg4[%c0_2, %c0_3] : memref<1x64xf32, #tpu.memory_space<vmem>>, vector<1x64xf32>
    %3 = vector.broadcast %2 : vector<1x64xf32> to vector<16x64xf32>
    %4 = arith.mulf %1, %3 : vector<16x64xf32>
    %c0_4 = arith.constant 0 : index
    %c0_5 = arith.constant 0 : index
    %5 = vector.load %arg5[%c0_4, %c0_5] : memref<1x64xf32, #tpu.memory_space<vmem>>, vector<1x64xf32>
    %6 = vector.broadcast %5 : vector<1x64xf32> to vector<16x64xf32>
    %7 = arith.addf %4, %6 : vector<16x64xf32>
    %cst = arith.constant 0.000000e+00 : f32
    %8 = vector.broadcast %cst : f32 to vector<16x64xf32>
    %9 = arith.maximumf %7, %8 : vector<16x64xf32>
    %cst_6 = arith.constant 0.000000e+00 : f32
    %10 = vector.broadcast %cst_6 : f32 to vector<1x64xf32>
    %c0_7 = arith.constant 0 : index
    %c0_8 = arith.constant 0 : index
    %11 = vector.load %arg9[%c0_7, %c0_8] : memref<18x64xf32, #tpu.memory_space<vmem>>, vector<1x64xf32>
    tpu.vector_store %arg9[%c0_7, %c0_8], %10 {strides = array<i32>} : memref<18x64xf32, #tpu.memory_space<vmem>>, vector<1x64xf32>,
    %cst_9 = arith.constant 0.000000e+00 : f32
    %12 = vector.broadcast %cst_9 : f32 to vector<1x64xf32>
    %c17 = arith.constant 17 : index
    %c0_10 = arith.constant 0 : index
    %13 = vector.load %arg9[%c17, %c0_10] : memref<18x64xf32, #tpu.memory_space<vmem>>, vector<1x64xf32>
    tpu.vector_store %arg9[%c17, %c0_10], %12 {strides = array<i32>} : memref<18x64xf32, #tpu.memory_space<vmem>>, vector<1x64xf32>,
    %c1 = arith.constant 1 : index
    %c0_11 = arith.constant 0 : index
    %14 = vector.load %arg9[%c1, %c0_11] : memref<18x64xf32, #tpu.memory_space<vmem>>, vector<16x64xf32>
    tpu.vector_store %arg9[%c1, %c0_11], %9 {strides = array<i32>} : memref<18x64xf32, #tpu.memory_space<vmem>>, vector<16x64xf32>,
    %c0_12 = arith.constant 0 : index
    %c0_13 = arith.constant 0 : index
    %15 = vector.load %arg9[%c0_12, %c0_13] : memref<18x64xf32, #tpu.memory_space<vmem>>, vector<16x64xf32>
    %c0_14 = arith.constant 0 : index
    %c0_15 = arith.constant 0 : index
    %c0_16 = arith.constant 0 : index
    %16 = vector.load %arg2[%c0_14, %c0_15, %c0_16] : memref<3x64x64xf32, #tpu.memory_space<vmem>>, vector<1x64x64xf32>
    %17 = vector.shape_cast %16 : vector<1x64x64xf32> to vector<64x64xf32>
    %cst_17 = arith.constant dense<0.000000e+00> : vector<16x64xf32>
    %18 = tpu.matmul %15, %17, %cst_17 {dimension_numbers = #tpu.dot_dimension_numbers<[1], [0], [0], [1], [0, 0, 1, 1], [], []>} : vector<16x64xf32>, vector<64x64xf32>, vector<16x64xf32> -> vector<16x64xf32>
    %c1_18 = arith.constant 1 : index
    %c0_19 = arith.constant 0 : index
    %19 = vector.load %arg9[%c1_18, %c0_19] : memref<18x64xf32, #tpu.memory_space<vmem>>, vector<16x64xf32>
    %c1_20 = arith.constant 1 : index
    %c0_21 = arith.constant 0 : index
    %c0_22 = arith.constant 0 : index
    %20 = vector.load %arg2[%c1_20, %c0_21, %c0_22] : memref<3x64x64xf32, #tpu.memory_space<vmem>>, vector<1x64x64xf32>
    %21 = vector.shape_cast %20 : vector<1x64x64xf32> to vector<64x64xf32>
    %cst_23 = arith.constant dense<0.000000e+00> : vector<16x64xf32>
    %22 = tpu.matmul %19, %21, %cst_23 {dimension_numbers = #tpu.dot_dimension_numbers<[1], [0], [0], [1], [0, 0, 1, 1], [], []>} : vector<16x64xf32>, vector<64x64xf32>, vector<16x64xf32> -> vector<16x64xf32>
    %23 = arith.addf %18, %22 : vector<16x64xf32>
    %c2 = arith.constant 2 : index
    %c0_24 = arith.constant 0 : index
    %24 = vector.load %arg9[%c2, %c0_24] : memref<18x64xf32, #tpu.memory_space<vmem>>, vector<16x64xf32>
    %c2_25 = arith.constant 2 : index
    %c0_26 = arith.constant 0 : index
    %c0_27 = arith.constant 0 : index
    %25 = vector.load %arg2[%c2_25, %c0_26, %c0_27] : memref<3x64x64xf32, #tpu.memory_space<vmem>>, vector<1x64x64xf32>
    %26 = vector.shape_cast %25 : vector<1x64x64xf32> to vector<64x64xf32>
    %cst_28 = arith.constant dense<0.000000e+00> : vector<16x64xf32>
    %27 = tpu.matmul %24, %26, %cst_28 {dimension_numbers = #tpu.dot_dimension_numbers<[1], [0], [0], [1], [0, 0, 1, 1], [], []>} : vector<16x64xf32>, vector<64x64xf32>, vector<16x64xf32> -> vector<16x64xf32>
    %28 = arith.addf %23, %27 : vector<16x64xf32>
    %c0_29 = arith.constant 0 : index
    %c0_30 = arith.constant 0 : index
    %29 = vector.load %arg6[%c0_29, %c0_30] : memref<1x64xf32, #tpu.memory_space<vmem>>, vector<1x64xf32>
    %30 = vector.broadcast %29 : vector<1x64xf32> to vector<16x64xf32>
    %31 = arith.mulf %28, %30 : vector<16x64xf32>
    %c0_31 = arith.constant 0 : index
    %c0_32 = arith.constant 0 : index
    %32 = vector.load %arg7[%c0_31, %c0_32] : memref<1x64xf32, #tpu.memory_space<vmem>>, vector<1x64xf32>
    %33 = vector.broadcast %32 : vector<1x64xf32> to vector<16x64xf32>
    %34 = arith.addf %31, %33 : vector<16x64xf32>
    %cst_33 = arith.constant 0.000000e+00 : f32
    %35 = vector.broadcast %cst_33 : f32 to vector<16x64xf32>
    %36 = arith.maximumf %34, %35 : vector<16x64xf32>
    %cst_34 = arith.constant 0.000000e+00 : f32
    %37 = vector.broadcast %cst_34 : f32 to vector<1x64xf32>
    %c0_35 = arith.constant 0 : index
    %c0_36 = arith.constant 0 : index
    %38 = vector.load %arg10[%c0_35, %c0_36] : memref<18x64xf32, #tpu.memory_space<vmem>>, vector<1x64xf32>
    tpu.vector_store %arg10[%c0_35, %c0_36], %37 {strides = array<i32>} : memref<18x64xf32, #tpu.memory_space<vmem>>, vector<1x64xf32>,
    %cst_37 = arith.constant 0.000000e+00 : f32
    %39 = vector.broadcast %cst_37 : f32 to vector<1x64xf32>
    %c17_38 = arith.constant 17 : index
    %c0_39 = arith.constant 0 : index
    %40 = vector.load %arg10[%c17_38, %c0_39] : memref<18x64xf32, #tpu.memory_space<vmem>>, vector<1x64xf32>
    tpu.vector_store %arg10[%c17_38, %c0_39], %39 {strides = array<i32>} : memref<18x64xf32, #tpu.memory_space<vmem>>, vector<1x64xf32>,
    %c1_40 = arith.constant 1 : index
    %c0_41 = arith.constant 0 : index
    %41 = vector.load %arg10[%c1_40, %c0_41] : memref<18x64xf32, #tpu.memory_space<vmem>>, vector<16x64xf32>
    tpu.vector_store %arg10[%c1_40, %c0_41], %36 {strides = array<i32>} : memref<18x64xf32, #tpu.memory_space<vmem>>, vector<16x64xf32>,
    %c0_42 = arith.constant 0 : index
    %c0_43 = arith.constant 0 : index
    %42 = vector.load %arg10[%c0_42, %c0_43] : memref<18x64xf32, #tpu.memory_space<vmem>>, vector<16x64xf32>
    %c0_44 = arith.constant 0 : index
    %c0_45 = arith.constant 0 : index
    %c0_46 = arith.constant 0 : index
    %43 = vector.load %arg3[%c0_44, %c0_45, %c0_46] : memref<3x64x64xf32, #tpu.memory_space<vmem>>, vector<1x64x64xf32>
    %44 = vector.shape_cast %43 : vector<1x64x64xf32> to vector<64x64xf32>
    %cst_47 = arith.constant dense<0.000000e+00> : vector<16x64xf32>
    %45 = tpu.matmul %42, %44, %cst_47 {dimension_numbers = #tpu.dot_dimension_numbers<[1], [0], [0], [1], [0, 0, 1, 1], [], []>} : vector<16x64xf32>, vector<64x64xf32>, vector<16x64xf32> -> vector<16x64xf32>
    %c1_48 = arith.constant 1 : index
    %c0_49 = arith.constant 0 : index
    %46 = vector.load %arg10[%c1_48, %c0_49] : memref<18x64xf32, #tpu.memory_space<vmem>>, vector<16x64xf32>
    %c1_50 = arith.constant 1 : index
    %c0_51 = arith.constant 0 : index
    %c0_52 = arith.constant 0 : index
    %47 = vector.load %arg3[%c1_50, %c0_51, %c0_52] : memref<3x64x64xf32, #tpu.memory_space<vmem>>, vector<1x64x64xf32>
    %48 = vector.shape_cast %47 : vector<1x64x64xf32> to vector<64x64xf32>
    %cst_53 = arith.constant dense<0.000000e+00> : vector<16x64xf32>
    %49 = tpu.matmul %46, %48, %cst_53 {dimension_numbers = #tpu.dot_dimension_numbers<[1], [0], [0], [1], [0, 0, 1, 1], [], []>} : vector<16x64xf32>, vector<64x64xf32>, vector<16x64xf32> -> vector<16x64xf32>
    %50 = arith.addf %45, %49 : vector<16x64xf32>
    %c2_54 = arith.constant 2 : index
    %c0_55 = arith.constant 0 : index
    %51 = vector.load %arg10[%c2_54, %c0_55] : memref<18x64xf32, #tpu.memory_space<vmem>>, vector<16x64xf32>
    %c2_56 = arith.constant 2 : index
    %c0_57 = arith.constant 0 : index
    %c0_58 = arith.constant 0 : index
    %52 = vector.load %arg3[%c2_56, %c0_57, %c0_58] : memref<3x64x64xf32, #tpu.memory_space<vmem>>, vector<1x64x64xf32>
    %53 = vector.shape_cast %52 : vector<1x64x64xf32> to vector<64x64xf32>
    %cst_59 = arith.constant dense<0.000000e+00> : vector<16x64xf32>
    %54 = tpu.matmul %51, %53, %cst_59 {dimension_numbers = #tpu.dot_dimension_numbers<[1], [0], [0], [1], [0, 0, 1, 1], [], []>} : vector<16x64xf32>, vector<64x64xf32>, vector<16x64xf32> -> vector<16x64xf32>
    %55 = arith.addf %50, %54 : vector<16x64xf32>
    %56 = arith.addf %55, %1 : vector<16x64xf32>
    %c0_60 = arith.constant 0 : index
    %c0_61 = arith.constant 0 : index
    %c0_62 = arith.constant 0 : index
    %57 = vector.load %arg8[%c0_60, %c0_61, %c0_62] : memref<1x16x64xf32, #tpu.memory_space<vmem>>, vector<1x16x64xf32>
    %58 = vector.shape_cast %57 : vector<1x16x64xf32> to vector<16x64xf32>
    %59 = vector.shape_cast %56 : vector<16x64xf32> to vector<1x16x64xf32>
    tpu.vector_store %arg8[%c0_60, %c0_61, %c0_62], %59 {strides = array<i32>} : memref<1x16x64xf32, #tpu.memory_space<vmem>>, vector<1x16x64xf32>,
    return
  }
  func.func @transform_0(%arg0: i32) -> (i32, i32, i32) {
    %c0_i32 = arith.constant 0 : i32
    %c0_i32_0 = arith.constant 0 : i32
    %c0_i32_1 = arith.constant 0 : i32
    return %arg0, %c0_i32, %c0_i32_0 : i32, i32, i32
  }
  func.func @transform_1(%arg0: i32) -> (i32, i32, i32) {
    %c0_i32 = arith.constant 0 : i32
    %c0_i32_0 = arith.constant 0 : i32
    %c0_i32_1 = arith.constant 0 : i32
    %c0_i32_2 = arith.constant 0 : i32
    return %c0_i32, %c0_i32_0, %c0_i32_1 : i32, i32, i32
  }
  func.func @transform_2(%arg0: i32) -> (i32, i32, i32) {
    %c0_i32 = arith.constant 0 : i32
    %c0_i32_0 = arith.constant 0 : i32
    %c0_i32_1 = arith.constant 0 : i32
    %c0_i32_2 = arith.constant 0 : i32
    return %c0_i32, %c0_i32_0, %c0_i32_1 : i32, i32, i32
  }
  func.func @transform_3(%arg0: i32) -> (i32, i32) {
    %c0_i32 = arith.constant 0 : i32
    %c0_i32_0 = arith.constant 0 : i32
    %c0_i32_1 = arith.constant 0 : i32
    return %c0_i32, %c0_i32_0 : i32, i32
  }
  func.func @transform_4(%arg0: i32) -> (i32, i32) {
    %c0_i32 = arith.constant 0 : i32
    %c0_i32_0 = arith.constant 0 : i32
    %c0_i32_1 = arith.constant 0 : i32
    return %c0_i32, %c0_i32_0 : i32, i32
  }
  func.func @transform_5(%arg0: i32) -> (i32, i32) {
    %c0_i32 = arith.constant 0 : i32
    %c0_i32_0 = arith.constant 0 : i32
    %c0_i32_1 = arith.constant 0 : i32
    return %c0_i32, %c0_i32_0 : i32, i32
  }
  func.func @transform_6(%arg0: i32) -> (i32, i32) {
    %c0_i32 = arith.constant 0 : i32
    %c0_i32_0 = arith.constant 0 : i32
    %c0_i32_1 = arith.constant 0 : i32
    return %c0_i32, %c0_i32_0 : i32, i32
  }
  func.func @transform_7(%arg0: i32) -> (i32, i32, i32) {
    %c0_i32 = arith.constant 0 : i32
    %c0_i32_0 = arith.constant 0 : i32
    %c0_i32_1 = arith.constant 0 : i32
    return %arg0, %c0_i32, %c0_i32_0 : i32, i32, i32
  }
}

</mosaic_0001>

<bundles_post_ra>
// kernel: tpu_custom_call.1
= control target key start
LH: loop header
LB: loop body
LE: loop exit
PB: predicated region body
PF: predicated region fallthrough
CT: control target
= control target key end

     0   :  { %12 = vsyncpa [#allocation5], 0  ;;  %s1920_s0 = inlined_call_operand.hbm [shape: f32[2,16,64], index: 0, kind: input, shape index: {}]   ;;  %s1921_s1 = inlined_call_operand.hbm [shape: f32[3,64,64], index: 1, kind: input, shape index: {}]   ;;  %s1922_s2 = inlined_call_operand.hbm [shape: f32[3,64,64], index: 2, kind: input, shape index: {}]   ;;  %s1923_s3 = inlined_call_operand.vmem [shape: f32[1,64], index: 3, kind: input, shape index: {}]   ;;  %s1924_s4 = inlined_call_operand.vmem [shape: f32[1,64], index: 4, kind: input, shape index: {}]   ;;  %s1925_s5 = inlined_call_operand.vmem [shape: f32[1,64], index: 5, kind: input, shape index: {}]   ;;  %s1926_s6 = inlined_call_operand.vmem [shape: f32[1,64], index: 6, kind: input, shape index: {}]   ;;  %s1927_s7 = inlined_call_operand.hbm [shape: f32[2,16,64], index: 7, kind: output, shape index: {}]  }
   0x1   :  { %14 = vsyncpa [#allocation5 + $0x1], 0 }
   0x2   :  { %15 = vsyncpa [#allocation8], 0 }
   0x3   :  { %16 = vsyncpa [#allocation6], 0 }
   0x4   :  { %18 = vsyncpa [#allocation6 + $0x1], 0  ;;  %s1635_s24 = smov 0   ;;  %s1637_s25 = smov 0  }
   0x5   :  { %s1639_s26 = smov 0   ;;  %s1641_s27 = smov 0  }
   0x6 LB: > { %s1656_s28 = sadd.s32 4294967295, %s1584_s27   ;;  %s1042_s29 = sadd.s32 4294967294, %s1584_s27   ;;  %s1584_s27 = sphi %s1641_s27, %s1949_s27   ;;  %s1580_s26 = sphi %s1639_s26, %s1948_s26   ;;  %s1576_s25 = sphi %s1637_s25, %s1947_s25   ;;  %s1572_s24 = sphi %s1635_s24, %s1946_s24  }
   0x7   : > { %p44_p0 = scmp.ne.s32.totalorder %s1576_s25, %s1572_s24  ;;  %p1928_p1 = scmp.eq.s32.totalorder %s1656_s28, 0 }
   0x8   : > { %p200_p3 = scmp.eq.s32.totalorder %s1042_s29, 1  ;;  %p1043_p5 = scmp.ge.s32.totalorder %s1584_s27, 1 }
   0x9   : > { %p1665_p4 = por %p1928_p1, %p44_p0  ;;  %p207_p7 = scmp.lt.s32.totalorder %s1584_s27, 3 }
   0xa   : > { %p1670_p6 = por %p200_p3, %p44_p0  ;;  %s1586_s10 = smov [#allocation7]  }
   0xb   : > { %s1932_s30 = scalar_select %p1665_p4, 1, 0 }
   0xc   : > { %s1933_s8 = scalar_select %p1670_p6, 1, 0 }
   0xd   : > { %p1675_p8 = pnand %p1043_p5, %p207_p7  ;;  %s219_s11 = sshll.u32 %s1586_s10, 4  ;;  %s1679_s11 = int_to_ptr.vmem [resolvable:$true] %s219_s11 }
   0xe   : > { %s1587_s13 = smov [#allocation9]   ;;  %s1428_s17 = scalar_lea.hbm %s1921_s1, 3072 }
   0xf   : > { %p1368_p9 = pneg %p1675_p8  ;;  %s232_s14 = sshll.u32 %s1587_s13, 4  ;;  %s1690_s14 = int_to_ptr.vmem [resolvable:$true] %s232_s14 }
  0x10   : > { %p1429_p12 = scmp.ne.s32.totalorder %s1921_s1, %s1428_s17  ;;  %p1435_p5 = scmp.lt.u32.totalorder %s1428_s17, %s1921_s1 }
  0x11   : > { %p1686_p11 = pnand %p1368_p9, %p1928_p1 }
  0x13   : > { %p1430_p13 = pneg %p1686_p11 }
  0x15   : > { %p1431_p0 = pnand %p1430_p13, %p1429_p12 }
  0x17   : > { %p1432_p3 = pneg %p1431_p0 }
  0x19   : > { %p1437_p7 = pnand %p1435_p5, %p1432_p3 }
  0x1b   : > { %1440 = shalt.err (!%p1437_p7)
}
  0x1c   : > { %s1441_s22 = scalar_lea.vmem %s1679_s11, 3072  ;;  %p1449_p2 = scmp.lt.s32.totalorder %s1679_s11, %s1679_s11 }
  0x1d   : > { %p1442_p9 = scmp.ne.s32.totalorder %s1679_s11, %s1441_s22  ;;  %p1450_p12 = scmp.lt.s32.totalorder %s1441_s22, %s1441_s22 }
  0x1f   : > { %p1444_p10 = pnand %p1442_p9, %p1430_p13  ;;  %p1451_p0 = por %p1450_p12, %p1449_p2 }
  0x21   : > { %p1445_p1 = pneg %p1444_p10 }
  0x23   : > { %p1452_p6 = pnand %p1451_p0, %p1445_p1 }
  0x25   : > { %1455 = shalt.err (!%p1452_p6)
}
  0x26   : > { %s1929_s23 = smov 128   ;;  %s1589_s29 = smov 8  }
  0x27   : > { %1371 = dma.hbm_to_vmem [thread:$0]  (!%p1686_p11), %s1921_s1, 3072, %s1679_s11, [#allocation8], %s1929_s23, %s1929_s23, %s1589_s29  }
  0x28   : > { %s1456_s17 = scalar_lea.hbm %s1922_s2, 3072 }
  0x29   : > { %p1457_p1 = scmp.ne.s32.totalorder %s1922_s2, %s1456_s17  ;;  %p1463_p10 = scmp.lt.u32.totalorder %s1456_s17, %s1922_s2 }
  0x2b   : > { %p1459_p2 = pnand %p1457_p1, %p1430_p13 }
  0x2d   : > { %p1460_p6 = pneg %p1459_p2 }
  0x2f   : > { %p1465_p3 = pnand %p1463_p10, %p1460_p6 }
  0x31   : > { %1468 = shalt.err (!%p1465_p3)
}
  0x32   : > { %s1469_s11 = scalar_lea.vmem %s1690_s14, 3072  ;;  %p1477_p12 = scmp.lt.s32.totalorder %s1690_s14, %s1690_s14 }
  0x33   : > { %p1470_p5 = scmp.ne.s32.totalorder %s1690_s14, %s1469_s11  ;;  %p1478_p0 = scmp.lt.s32.totalorder %s1469_s11, %s1469_s11 }
  0x35   : > { %p1472_p7 = pnand %p1470_p5, %p1430_p13  ;;  %p1479_p1 = por %p1478_p0, %p1477_p12 }
  0x37   : > { %p1473_p9 = pneg %p1472_p7 }
  0x39   : > { %p1480_p2 = pnand %p1479_p1, %p1473_p9 }
  0x3b   : > { %1483 = shalt.err (!%p1480_p2)
}
  0x3c   : > { %1374 = dma.hbm_to_vmem [thread:$0]  (!%p1686_p11), %s1922_s2, 3072, %s1690_s14, [#allocation8], %s1929_s23, %s1929_s23, %s1589_s29  }
  0x3d   : > { %s1751_s12 = sadd.s32 1, %s1584_s27   ;;  %s31_s13 = sadd.s32 1, %s1580_s26 }
  0x3e   : > { %s28_s15 = ssub.s32 %s1584_s27, %s1751_s12  ;;  %p38_p13 = scmp.ne.s32.totalorder %s1580_s26, %s1576_s25 }
  0x3f   : > { %p29_p6 = scmp.eq.s32.totalorder %s28_s15, 0  ;;  %p39_p10 = scmp.eq.s32.totalorder %s1584_s27, 0 }
  0x40   : > { %p1936_p3 = scmp.eq.s32.totalorder %s1656_s28, 1  ;;  %p1385_p7 = scmp.lt.s32.totalorder %s1584_s27, 2 }
  0x41   : > { %s1767_s17 = scalar_select %p29_p6, %s1580_s26, %s31_s13  }
  0x42   : > { %p1761_p5 = por %p1936_p3, %p38_p13  ;;  %p40_p9 = por %p39_p10, %p38_p13 }
  0x43   : > { %s258_s18 = sand.u32 1, %s1580_s26   ;;  %s1076_s14 = sshll.u32 %s1584_s27, 8 }
  0x44   : > { %s1937_s16 = scalar_select %p1761_p5, 1, 0 }
  0x45   : > { %s1047_s19 = sshll.u32 %s258_s18, 4  ;;  %s1774_s11 = scalar_lea.hbm %s1920_s0, %s1076_s14 }
  0x46   : > { %s262_s22 = scalar_lea.vmem [#allocation4], %s1047_s19  ;;  %p1778_p11 = pnand %p1385_p7, %p40_p9 }
  0x47   : > { %s269_s10 = sshll.u32 %s262_s22, 4  ;;  %s1782_s15 = scalar_lea.sflag [#allocation5], %s258_s18  ;;  %s1776_s10 = int_to_ptr.vmem [resolvable:$true] %s269_s10 }
  0x48   : > { %s1484_s23 = scalar_lea.hbm %s1774_s11, 256  ;;  %p1486_p0 = pneg %p1778_p11 }
  0x49   : > { %p1485_p12 = scmp.ne.s32.totalorder %s1774_s11, %s1484_s23  ;;  %s1489_s20 = scalar_lea.hbm %s1920_s0, 512 }
  0x4a   : > { %p1490_p13 = scmp.lt.u32.totalorder %s1774_s11, %s1920_s0  ;;  %p1491_p6 = scmp.lt.u32.totalorder %s1489_s20, %s1484_s23 }
  0x4b   : > { %p1487_p1 = pnand %p1486_p0, %p1485_p12  ;;  %p1493_p3 = scmp.lt.u32.totalorder %s1484_s23, %s1774_s11 }
  0x4c   : > { %p1492_p10 = por %p1491_p6, %p1490_p13 }
  0x4d   : > { %p1488_p2 = pneg %p1487_p1 }
  0x4e   : > { %p1494_p7 = por %p1493_p3, %p1492_p10 }
  0x50   : > { %p1495_p9 = pnand %p1494_p7, %p1488_p2 }
  0x52   : > { %1498 = shalt.err (!%p1495_p9)
}
  0x53   : > { %s1499_s18 = scalar_lea.vmem %s1776_s10, 256  ;;  %s1590_s19 = smov [#allocation4]  }
  0x54   : > { %p1500_p12 = scmp.ne.s32.totalorder %s1776_s10, %s1499_s18  ;;  %s1504_s14 = sshll.u32 %s1590_s19, 4  ;;  %s1505_s14 = int_to_ptr.vmem [resolvable:$false] %s1504_s14 }
  0x55   : > { %s1506_s21 = scalar_lea.vmem %s1505_s14, 512  ;;  %p1507_p4 = scmp.lt.s32.totalorder %s1776_s10, %s1505_s14 }
  0x56   : > { %p1502_p1 = pnand %p1500_p12, %p1486_p0  ;;  %p1508_p13 = scmp.lt.s32.totalorder %s1506_s21, %s1499_s18 }
  0x58   : > { %p1503_p5 = pneg %p1502_p1  ;;  %p1509_p6 = por %p1508_p13, %p1507_p4 }
  0x5a   : > { %p1510_p10 = pnand %p1509_p6, %p1503_p5 }
  0x5c   : > { %1513 = shalt.err (!%p1510_p10)
}
  0x5d   : > { %s1939_s23 = smov 128   ;;  %281 = sbr.rel (%p1675_p8) target bundleno = 645 (0x285), region = 48 }
  0x5e   : > { %1378 = dma.hbm_to_vmem [thread:$0]  (!%p1778_p11), %s1774_s11, 256, %s1776_s10, %s1782_s15, %s1939_s23, %s1939_s23, %s1589_s29  }
  0x5f   : > { %s1816_s20 = sand.u32 (!%p1675_p8), 1, %s1576_s25   ;;  %p1940_p4 = scmp.ne.s32.totalorder (!%p1675_p8), %s1932_s30, 0 }
  0x60   : > { %s1051_s22 = sshll.u32 (!%p1675_p8), %s1816_s20, 4  ;;  %s284_s18 = scalar_lea.sflag (!%p1675_p8), [#allocation5], %s1816_s20 }
  0x61   : > { %s287_s13 = scalar_lea.vmem (!%p1675_p8), [#allocation4], %s1051_s22 }
  0x64   : > { %1559 = dma.done.wait (%p1940_p4), %s284_s18, 256  }
  0x65   : > { %1561 = vsyncadd (%p1940_p4), %s284_s18, 4294967040  ;;  %p1941_p5 = scmp.eq.s32.totalorder %s1656_s28, 0 }
  0x67   : > { %1563 = dma.done.wait (%p1941_p5), [#allocation8], 6144   ;;  %p1942_p8 = pmov %p1941_p5 }
  0x68   : > { %vm348_vm0 = vcmask 516096   ;;  %v1591_v0 = vmov 0.0   ;;  %v367_v1 = vld [vmem:[#allocation7 + $0x40] sm:$0xff]  ;;  %v368_v2 = vld [vmem:[#allocation7 + $0x48] sm:$0xff]  ;;  %v369_v3 = vld [vmem:[#allocation7 + $0x50] sm:$0xff]  ;;  %vm351_vm1 = vcmask 523264  }
  0x69   : > { %1565 = vsyncadd (%p1942_p8), [#allocation8], 4294961152  ;;  %349 = vst.msk [vmem:[#allocation2] sm:$0x1] %vm348_vm0, %v1591_v0  ;;  %v1252_v4 = vpack.c.bf16 %v368_v2, %v367_v1  ;;  %v370_v5 = vld [vmem:[#allocation7 + $0x58] sm:$0xff]  ;;  %v371_v7 = vld [vmem:[#allocation7 + $0x60] sm:$0xff] }
  0x6a   : > { %350 = vst.msk [vmem:[#allocation2 + $0x11] sm:$0x1] %vm348_vm0, %v1591_v0  ;;  %651 = vst.msk [vmem:[#allocation3] sm:$0x1] %vm348_vm0, %v1591_v0  ;;  %v1256_v6 = vpack.c.bf16 %v370_v5, %v369_v3  ;;  %v372_v8 = vld [vmem:[#allocation7 + $0x68] sm:$0xff]  ;;  %v1830_v9 = vld [vmem:[%s287_s13] sm:$0xff] }
  0x6b   : > { %652 = vst.msk [vmem:[#allocation3 + $0x11] sm:$0x1] %vm348_vm0, %v1591_v0  ;;  %1253 = vmatprep.subr.bf16.mxu0 %v1252_v4  ;;  %v1832_v10 = vld [vmem:[%s287_s13 + $0x8] sm:$0xff]  ;;  %v1055_v11 = vld [vmem:[%s1923_s3] ss:$0 sm:$0xff]  ;;  %v1260_v15 = vpack.c.bf16 %v372_v8, %v371_v7  ;;  %v356_v23 = vld [vmem:[#allocation7] sm:$0xff] }
  0x6c   : > { %v1056_v12 = vld [vmem:[%s1924_s4] ss:$0 sm:$0xff]  ;;  %1255 = vmatpush3.bf16.msra.mxu0 %v1252_v4  ;;  %v335_v13 = vmul.f32 %v1055_v11, %v1830_v9  ;;  %v336_v14 = vmul.f32 %v1055_v11, %v1832_v10  ;;  %v374_v17 = vld [vmem:[#allocation7 + $0x78] sm:$0xff]  ;;  %v357_v24 = vld [vmem:[#allocation7 + $0x8] sm:$0xff]  ;;  %s325_s21 = scalar_lea.vmem [#allocation10], %s1051_s22  ;;  %s1077_s18 = sshll.u32 %s1656_s28, 8 }
  0x6d   : > { %1257 = vmatprep.subr.bf16.mxu0 %v1256_v6  ;;  %v373_v16 = vld [vmem:[#allocation7 + $0x70] sm:$0xff]  ;;  %v1268_v25 = vpack.c.bf16 %v357_v24, %v356_v23  ;;  %v359_v27 = vld [vmem:[#allocation7 + $0x18] sm:$0xff]  ;;  %v360_v32 = vld [vmem:[#allocation7 + $0x20] sm:$0xff]  ;;  %s950_s23 = sshll.u32 %s325_s21, 4  ;;  %s1873_s9 = scalar_lea.hbm %s1927_s7, %s1077_s18  ;;  %s1867_s23 = int_to_ptr.vmem [resolvable:$true] %s950_s23 }
  0x6e   : > { %v344_v18 = vadd.f32 %v1056_v12, %v335_v13  ;;  %v345_v19 = vadd.f32 %v1056_v12, %v336_v14  ;;  %v1264_v22 = vpack.c.bf16 %v374_v17, %v373_v16  ;;  %v358_v26 = vld [vmem:[#allocation7 + $0x10] sm:$0xff]  ;;  %v361_v33 = vld [vmem:[#allocation7 + $0x28] sm:$0xff]  ;;  %v363_v36 = vld [vmem:[#allocation7 + $0x38] sm:$0xff]  ;;  %s937_s28 = scalar_lea.sflag [#allocation6], %s1816_s20  ;;  %s1514_s22 = scalar_lea.vmem %s1867_s23, 256 }
  0x6f   : > { %v1272_v30 = vpack.c.bf16 %v359_v27, %v358_v26  ;;  %v1276_v34 = vpack.c.bf16 %v361_v33, %v360_v32  ;;  %v362_v35 = vld [vmem:[#allocation7 + $0x30] sm:$0xff]  ;;  %v540_v38 = vld [vmem:[#allocation7 + $0x80] sm:$0xff]  ;;  %v541_v39 = vld [vmem:[#allocation7 + $0x88] sm:$0xff]  ;;  %p1515_p11 = scmp.ne.s32.totalorder %s1867_s23, %s1514_s22  ;;  %p1943_p0 = scmp.ne.s32.totalorder %s1937_s16, 0 }
  0x70   : > { %1259 = vmatpush3.bf16.msra.mxu0 %v1256_v6  ;;  %v346_v20 = vmax.f32 %v344_v18, 0.0  ;;  %v347_v21 = vmax.f32 %v345_v19, 0.0  ;;  %v1280_v37 = vpack.c.bf16 %v363_v36, %v362_v35  ;;  %v1284_v40 = vpack.c.bf16 %v541_v39, %v540_v38  ;;  %v542_v41 = vld [vmem:[#allocation7 + $0x90] sm:$0xff]  ;;  %v543_v42 = vld [vmem:[#allocation7 + $0x98] sm:$0xff]  ;;  %v544_v46 = vld [vmem:[#allocation7 + $0xa0] sm:$0xff]  ;;  %s1592_s29 = smov [#allocation10]  }
  0x71   : > { %1261 = vmatprep.subr.bf16.mxu0 %v1260_v15  ;;  %v1288_v44 = vpack.c.bf16 %v543_v42, %v542_v41  ;;  %v545_v47 = vld [vmem:[#allocation7 + $0xa8] sm:$0xff]  ;;  %v546_v49 = vld [vmem:[#allocation7 + $0xb0] sm:$0xff]  ;;  %v547_v50 = vld [vmem:[#allocation7 + $0xb8] sm:$0xff]  ;;  %p1516_p2 = pnand %p1515_p11, %p1943_p0  ;;  %s1518_s11 = sshll.u32 %s1592_s29, 4  ;;  %s1519_s11 = int_to_ptr.vmem [resolvable:$false] %s1518_s11 }
  0x72   : > { %352 = vst.msk [vmem:[#allocation2 + $0x1] sm:$0xff] %vm351_vm1, %v346_v20  ;;  %353 = vst.msk [vmem:[#allocation2 + $0x9] sm:$0xff] %vm351_vm1, %v347_v21  ;;  %v1292_v48 = vpack.c.bf16 %v545_v47, %v544_v46  ;;  %v1296_v51 = vpack.c.bf16 %v547_v50, %v546_v49  ;;  %v668_v53 = vld [vmem:[#allocation9 + $0x40] sm:$0xff]  ;;  %v669_v54 = vld [vmem:[#allocation9 + $0x48] sm:$0xff]  ;;  %s1520_s10 = scalar_lea.vmem %s1519_s11, 512  ;;  %p1521_p7 = scmp.lt.s32.totalorder %s1867_s23, %s1519_s11 }
  0x73   : > { %v1300_v55 = vpack.c.bf16 %v669_v54, %v668_v53  ;;  %v670_v56 = vld [vmem:[#allocation9 + $0x50] sm:$0xff]  ;;  %v671_v57 = vld [vmem:[#allocation9 + $0x58] sm:$0xff]  ;;  %v672_v59 = vld [vmem:[#allocation9 + $0x60] sm:$0xff]  ;;  %p1517_p3 = pneg %p1516_p2  ;;  %p1522_p9 = scmp.lt.s32.totalorder %s1520_s10, %s1514_s22 }
  0x74   : > { %1263 = vmatpush3.bf16.msra.mxu0 %v1260_v15  ;;  %v1304_v58 = vpack.c.bf16 %v671_v57, %v670_v56  ;;  %v673_v60 = vld [vmem:[#allocation9 + $0x68] sm:$0xff]  ;;  %v674_v62 = vld [vmem:[#allocation9 + $0x70] sm:$0xff]  ;;  %v675_v63 = vld [vmem:[#allocation9 + $0x78] sm:$0xff] }
  0x75   : > { %1265 = vmatprep.subr.bf16.mxu0 %v1264_v22  ;;  %1301 = vmatprep.subr.bf16.mxu1 %v1300_v55  ;;  %v1308_v61 = vpack.c.bf16 %v673_v60, %v672_v59  ;;  %v1312_v0 = vpack.c.bf16 %v675_v63, %v674_v62  ;;  %v657_v1 = vld [vmem:[#allocation9] sm:$0xff]  ;;  %v658_v2 = vld [vmem:[#allocation9 + $0x8] sm:$0xff]  ;;  %v1063_v4 = vld [vmem:[%s1925_s5] ss:$0 sm:$0xff]  ;;  %p1523_p12 = por %p1522_p9, %p1521_p7 }
  0x76   : > { %1303 = vmatpush3.bf16.msra.mxu1 %v1300_v55  ;;  %v1316_v3 = vpack.c.bf16 %v658_v2, %v657_v1  ;;  %v1064_v6 = vld [vmem:[%s1926_s6] ss:$0 sm:$0xff]  ;;  %v660_v17 = vld [vmem:[#allocation9 + $0x18] sm:$0xff]  ;;  %v661_v21 = vld [vmem:[#allocation9 + $0x20] sm:$0xff] }
  0x77   : > { %1305 = vmatprep.subr.bf16.mxu1 %v1304_v58  ;;  %v659_v16 = vld [vmem:[#allocation9 + $0x10] sm:$0xff]  ;;  %v664_v26 = vld [vmem:[#allocation9 + $0x38] sm:$0xff]  ;;  %v845_v35 = vld [vmem:[#allocation9 + $0xa0] sm:$0xff]  ;;  %p1524_p1 = pnand %p1523_p12, %p1517_p3 }
  0x78   : > { %1267 = vmatpush3.bf16.msra.mxu0 %v1264_v22  ;;  %v1320_v19 = vpack.c.bf16 %v660_v17, %v659_v16  ;;  %v662_v22 = vld [vmem:[#allocation9 + $0x28] sm:$0xff]  ;;  %v844_v32 = vld [vmem:[#allocation9 + $0x98] sm:$0xff]  ;;  %v847_v39 = vld [vmem:[#allocation9 + $0xb0] sm:$0xff] }
  0x79   : > { %v364_v28 = vld [vmem:[#allocation2 + $0x1] sm:$0xff]  ;;  %1269 = vmatprep.subr.bf16.mxu0 %v1268_v25  ;;  %v365_v29 = vld [vmem:[#allocation2 + $0x9] sm:$0xff]  ;;  %v1324_v24 = vpack.c.bf16 %v662_v22, %v661_v21  ;;  %v846_v36 = vld [vmem:[#allocation9 + $0xa8] sm:$0xff] }
  0x7a   : > { %v354_v31 = vld [vmem:[#allocation2] sm:$0xff]  ;;  %1154 = vmatprep.mubr.msk.f32.mxu0 %vm351_vm1, %v364_v28  ;;  %v355_v43 = vld [vmem:[#allocation2 + $0x8] sm:$0xff]  ;;  %1307 = vmatpush3.bf16.msra.mxu1 %v1304_v58  ;;  %v841_v28 = vld [vmem:[#allocation9 + $0x80] sm:$0xff]  ;;  %v1340_v38 = vpack.c.bf16 %v846_v36, %v845_v35 }
  0x7b   : > { %1155 = vmatmul.mubr.msk.f32.vlgmr.msra.gmra.mrb[0].mxu0 %vm351_vm1, %v365_v29  ;;  %v537_v45 = vld [vmem:[#allocation2 + $0x2] sm:$0xff]  ;;  %v538_v52 = vld [vmem:[#allocation2 + $0xa] sm:$0xff]  ;;  %1309 = vmatprep.subr.bf16.mxu1 %v1308_v61  ;;  %v842_v29 = vld [vmem:[#allocation9 + $0x88] sm:$0xff] }
  0x7c   : > { %1271 = vmatpush3.bf16.msra.mxu0 %v1268_v25  ;;  %1173 = vmatprep.mubr.msk.f32.mxu0 %vm351_vm1, %v354_v31  ;;  %v663_v25 = vld [vmem:[#allocation9 + $0x30] sm:$0xff] }
  0x7d   : > { %1273 = vmatprep.subr.bf16.mxu0 %v1272_v30  ;;  %v1328_v27 = vpack.c.bf16 %v664_v26, %v663_v25  ;;  %v843_v31 = vld [vmem:[#allocation9 + $0x90] sm:$0xff] }
  0x7e   : > { %1311 = vmatpush3.bf16.msra.mxu1 %v1308_v61  ;;  %v1336_v33 = vpack.c.bf16 %v844_v32, %v843_v31 }
  0x7f   : > { %1313 = vmatprep.subr.bf16.mxu1 %v1312_v0 }
  0x80   : > { %1275 = vmatpush3.bf16.msra.mxu0 %v1272_v30  ;;  %v1332_v30 = vpack.c.bf16 %v842_v29, %v841_v28 }
  0x81   : > { %1277 = vmatprep.subr.bf16.mxu0 %v1276_v34 }
  0x82   : > { %1315 = vmatpush3.bf16.msra.mxu1 %v1312_v0 }
  0x83   : > { %1317 = vmatprep.subr.bf16.mxu1 %v1316_v3 }
  0x84   : > { %1279 = vmatpush3.bf16.msra.mxu0 %v1276_v34 }
  0x85   : > { %1281 = vmatprep.subr.bf16.mxu0 %v1280_v37 }
  0x88   : > { %1283 = vmatpush3.bf16.msra.mxu0 %v1280_v37 }
  0x89   : > { %1285 = vmatprep.subr.bf16.mxu0 %v1284_v40 }
  0x8b   : > { %1174 = vmatmul.mubr.msk.f32.vlgmr.msra.gmra.mrb[0].mxu0 %vm351_vm1, %v355_v43 }
  0x8c   : > { %1287 = vmatpush3.bf16.msra.mxu0 %v1284_v40  ;;  %1192 = vmatprep.mubr.msk.f32.mxu0 %vm351_vm1, %v537_v45  ;;  %v848_v40 = vld [vmem:[#allocation9 + $0xb8] sm:$0xff] }
  0x8d   : > { %1289 = vmatprep.subr.bf16.mxu0 %v1288_v44  ;;  %v1344_v41 = vpack.c.bf16 %v848_v40, %v847_v39 }
  0x90   : > { %1291 = vmatpush3.bf16.msra.mxu0 %v1288_v44 }
  0x91   : > { %1293 = vmatprep.subr.bf16.mxu0 %v1292_v48 }
  0x94   : > { %1295 = vmatpush3.bf16.msra.mxu0 %v1292_v48 }
  0x95   : > { %1297 = vmatprep.subr.bf16.mxu0 %v1296_v51 }
  0x98   : > { %1299 = vmatpush3.bf16.msra.mxu0 %v1296_v51 }
  0x9b   : > { %1193 = vmatmul.mubr.msk.f32.vlgmr.msra.gmra.mrb[0].mxu0 %vm351_vm1, %v538_v52 }
 0x16e   : > { %v1194_v5 = vpop.f32.mrb[0].mxu0 }
 0x16f   : > { %v639_v7 = vmul.f32 %v1194_v5, %v1063_v4  ;;  %v620_v8 = vpop.f32.mrb[1].mxu0 }
 0x170   : > { %v638_v11 = vmul.f32 %v1063_v4, %v620_v8 }
 0x171   : > { %v648_v12 = vadd.f32 %v1064_v6, %v639_v7 }
 0x172   : > { %v647_v13 = vadd.f32 %v1064_v6, %v638_v11 }
 0x173   : > { %v650_v14 = vmax.f32 %v648_v12, 0.0 }
 0x174   : > { %v649_v15 = vmax.f32 %v647_v13, 0.0 }
 0x175   : > { %654 = vst.msk [vmem:[#allocation3 + $0x9] sm:$0xff] %vm351_vm1, %v650_v14 }
 0x176   : > { %653 = vst.msk [vmem:[#allocation3 + $0x1] sm:$0xff] %vm351_vm1, %v649_v15 }
 0x17c   : > { %v666_v20 = vld [vmem:[#allocation3 + $0x9] sm:$0xff] }
 0x17d   : > { %v665_v18 = vld [vmem:[#allocation3 + $0x1] sm:$0xff]  ;;  %v839_v42 = vld [vmem:[#allocation3 + $0xa] sm:$0xff] }
 0x17e   : > { %1211 = vmatprep.mubr.msk.f32.mxu1 %vm351_vm1, %v665_v18  ;;  %v655_v23 = vld [vmem:[#allocation3] sm:$0xff]  ;;  %v656_v34 = vld [vmem:[#allocation3 + $0x8] sm:$0xff] }
 0x17f   : > { %1212 = vmatmul.mubr.msk.f32.vlgmr.msra.gmra.mrb[0].mxu1 %vm351_vm1, %v666_v20  ;;  %v838_v37 = vld [vmem:[#allocation3 + $0x2] sm:$0xff] }
 0x180   : > { %1319 = vmatpush3.bf16.msra.mxu1 %v1316_v3  ;;  %1230 = vmatprep.mubr.msk.f32.mxu1 %vm351_vm1, %v655_v23 }
 0x181   : > { %1321 = vmatprep.subr.bf16.mxu1 %v1320_v19 }
 0x184   : > { %1323 = vmatpush3.bf16.msra.mxu1 %v1320_v19 }
 0x185   : > { %1325 = vmatprep.subr.bf16.mxu1 %v1324_v24 }
 0x188   : > { %1327 = vmatpush3.bf16.msra.mxu1 %v1324_v24 }
 0x189   : > { %1329 = vmatprep.subr.bf16.mxu1 %v1328_v27 }
 0x18c   : > { %1331 = vmatpush3.bf16.msra.mxu1 %v1328_v27 }
 0x18d   : > { %1333 = vmatprep.subr.bf16.mxu1 %v1332_v30 }
 0x18f   : > { %1231 = vmatmul.mubr.msk.f32.vlgmr.msra.gmra.mrb[0].mxu1 %vm351_vm1, %v656_v34 }
 0x190   : > { %1335 = vmatpush3.bf16.msra.mxu1 %v1332_v30  ;;  %1249 = vmatprep.mubr.msk.f32.mxu1 %vm351_vm1, %v838_v37 }
 0x191   : > { %1337 = vmatprep.subr.bf16.mxu1 %v1336_v33 }
 0x194   : > { %1339 = vmatpush3.bf16.msra.mxu1 %v1336_v33 }
 0x195   : > { %1341 = vmatprep.subr.bf16.mxu1 %v1340_v38 }
 0x198   : > { %1343 = vmatpush3.bf16.msra.mxu1 %v1340_v38 }
 0x199   : > { %1345 = vmatprep.subr.bf16.mxu1 %v1344_v41 }
 0x19c   : > { %1347 = vmatpush3.bf16.msra.mxu1 %v1344_v41 }
 0x19f   : > { %1250 = vmatmul.mubr.msk.f32.vlgmr.msra.gmra.mrb[0].mxu1 %vm351_vm1, %v839_v42 }
 0x272   : > { %v1251_v43 = vpop.f32.mrb[0].mxu1 }
 0x273   : > { %v933_v44 = vadd.f32 %v1251_v43, %v1832_v10  ;;  %v921_v45 = vpop.f32.mrb[1].mxu1 }
 0x274   : > { %v932_v46 = vadd.f32 %v921_v45, %v1830_v9 }
 0x275   : > { %935 = vst.msk [vmem:[%s325_s21 + $0x8] sm:$0xff] %vm351_vm1, %v933_v44 }
 0x276   : > { %934 = vst.msk [vmem:[%s325_s21] sm:$0xff] %vm351_vm1, %v932_v46 }
 0x277   : > { %1527 = shalt.err (!%p1524_p1)
}
 0x278   : > { %s1528_s15 = scalar_lea.hbm %s1873_s9, 256  ;;  %s1532_s21 = scalar_lea.hbm %s1927_s7, 512 }
 0x279   : > { %p1529_p13 = scmp.ne.s32.totalorder %s1873_s9, %s1528_s15  ;;  %p1533_p4 = scmp.lt.u32.totalorder %s1873_s9, %s1927_s7 }
 0x27a   : > { %p1534_p5 = scmp.lt.u32.totalorder %s1532_s21, %s1528_s15  ;;  %p1536_p11 = scmp.lt.u32.totalorder %s1528_s15, %s1873_s9 }
 0x27b   : > { %p1530_p6 = pnand %p1529_p13, %p1943_p0 }
 0x27c   : > { %p1535_p8 = por %p1534_p5, %p1533_p4 }
 0x27d   : > { %p1531_p10 = pneg %p1530_p6 }
 0x27e   : > { %p1537_p2 = por %p1536_p11, %p1535_p8 }
 0x280   : > { %p1538_p3 = pnand %p1537_p2, %p1531_p10 }
 0x282   : > { %1541 = shalt.err (!%p1538_p3)
}
 0x283   : > { %s1593_s30 = smov 128   ;;  %s1594_s22 = smov 8  }
 0x284   : > { %1366 = dma.vmem_to_hbm [thread:$0]  (%p1943_p0), %s1867_s23, 256, %s1873_s9, %s937_s28, %s1593_s30, %s1593_s30, %s1594_s22  }
 0x285 PF: > { %s965_s29 = sand.u32 1, %s1572_s24   ;;  %p1944_p7 = scmp.ne.s32.totalorder %s1933_s8, 0 }
 0x286   : > { %p1945_p9 = scmp.ge.s32.totalorder %s1584_s27, 2  ;;  %s966_s11 = scalar_lea.sflag [#allocation6], %s965_s29 }
 0x288   : > { %p1380_p12 = pnand %p1945_p9, %p1944_p7 }
 0x28a   : > { %1567 = dma.done.wait (!%p1380_p12), %s966_s11, 256  }
 0x28b   : > { %1569 = vsyncadd (!%p1380_p12), %s966_s11, 4294967040  ;;  %p21_p1 = scmp.ge.s32.totalorder %s1751_s12, 4   ;;  %s1946_s24 = smov %s1576_s25 }
 0x28c   : > { %s1947_s25 = smov %s1580_s26  ;;  %s1948_s26 = smov %s1767_s17 }
 0x28d   : > { %s1949_s27 = smov %s1751_s12  ;;  %23 = sbr.rel (!%p21_p1) target bundleno = 6 (0x6), region = 105 }
 0x294   :  { %971 = vsyncpa [#allocation5], 1 }
 0x295   :  { %973 = vsyncpa [#allocation5 + $0x1], 1 }
 0x296   :  { %974 = vsyncpa [#allocation8], 1 }
 0x297   :  { %975 = vsyncpa [#allocation6], 1 }
 0x298   :  { %977 = vsyncpa [#allocation6 + $0x1], 1 }

</bundles_post_ra>
